<compile_context>
chip_gen: v7x
topology: tpu7x:2x2x1
jax: 0.10.0
libtpu: 0.0.40
codegen_flags: <defaults>
</compile_context>

<pallas_src>
import functools

import jax
import jax.numpy as jnp
from jax.experimental import pallas as pl
from jax.experimental.pallas import tpu as pltpu

LANE = 128


def _round_up(v, m):
    return ((v + m - 1) // m) * m


# ---------------------------------------------------------------------------
# Kernels
# ---------------------------------------------------------------------------
def linear_kernel(x_ref, w_ref, o_ref):
    """o_tile = x_tile @ W  (row-tiled feature transform, W resident)."""
    o_ref[...] = jnp.dot(x_ref[...], w_ref[...],
                         preferred_element_type=jnp.float32).astype(o_ref.dtype)


def aggregate_kernel(a_ref, z_ref, b_ref, o_ref, acc_ref, *, epilogue,
                     num_classes, z_resident, tk):
    """acc += A_row_tile @ Z_k_slab over k; epilogue = bias + act / log_softmax.

    a_ref  : (TM, TK)            compute dtype  A_hat row/col tile
    z_ref  : (TK, C) or (N, C)   compute dtype  XW1 / HW2 slab (or resident)
    b_ref  : (1, C)              f32            resident bias
    o_ref  : (TM, C)             out dtype
    acc_ref: (TM, C)             f32 scratch    accumulator
    """
    k = pl.program_id(1)

    @pl.when(k == 0)
    def _():
        acc_ref[...] = jnp.zeros_like(acc_ref)

    if z_resident:
        z = z_ref[pl.ds(pl.multiple_of(k * tk, tk), tk), :]
    else:
        z = z_ref[...]
    acc_ref[...] += jnp.dot(a_ref[...], z, preferred_element_type=jnp.float32)

    @pl.when(k == pl.num_programs(1) - 1)
    def _():
        y = acc_ref[...] + b_ref[...]                    # f32 all the way
        if epilogue == "leaky_relu":
            y = jnp.where(y > 0, y, 0.2 * y)             # leaky_relu(0.2)
        else:  # masked log_softmax over real class lanes
            lane = jax.lax.broadcasted_iota(jnp.int32, y.shape, 1)
            y = jnp.where(lane < num_classes, y, -jnp.inf)
            m = jnp.max(y, axis=1, keepdims=True)
            e = jnp.exp(y - m)
            y = y - (m + jnp.log(jnp.sum(e, axis=1, keepdims=True)))
        o_ref[...] = y.astype(o_ref.dtype)


# ---------------------------------------------------------------------------
# Glue (plain JAX): adjacency build, padding, pallas_call wrappers
# ---------------------------------------------------------------------------
def build_normalized_adjacency(edge_index, num_nodes):
    """Dense D^{-1/2} (A + I) D^{-1/2}; self-loops added only where missing."""
    src, dst = edge_index[0], edge_index[1]
    a = jnp.zeros((num_nodes, num_nodes), jnp.float32)
    a = a.at[dst, src].add(1.0)                 # scatter-add (PyG message flow)
    diag = jnp.diagonal(a)
    a = a + jnp.diag(jnp.where(diag > 0, 0.0, 1.0))   # add_remaining_self_loops
    deg = jnp.sum(a, axis=1)
    d_inv_sqrt = jnp.where(deg > 0, jax.lax.rsqrt(deg), 0.0)
    return a * d_inv_sqrt[:, None] * d_inv_sqrt[None, :]


def _pad2d(arr, rows, cols, dtype):
    out = jnp.zeros((rows, cols), dtype)
    return out.at[: arr.shape[0], : arr.shape[1]].set(arr.astype(dtype))


def _choose_tile(n, requested):
    """Largest lane-multiple tile <= requested keeping >= 2 row tiles."""
    tile = max(LANE, int(requested))
    rows = _round_up(n, LANE)
    while tile > LANE and rows < 2 * tile:
        tile //= 2
    return _round_up(max(tile, LANE), LANE)


def _vmem_limit(block_bytes, scratch_bytes):
    need = 2 * sum(block_bytes) + scratch_bytes + (2 << 20)
    return int(min(max(need, 16 << 20), 48 << 20))    # <=48MiB: v7x headroom


def _linear(x_p, w_p, *, tm, compute_dtype):
    """XW = X @ W, row-tiled, W resident in VMEM."""
    n_pad, fin_pad = x_p.shape
    cols = w_p.shape[1]
    ci = jnp.dtype(compute_dtype).itemsize
    blocks = [tm * fin_pad * ci, fin_pad * cols * ci, tm * cols * ci]
    return pl.pallas_call(
        linear_kernel,
        out_shape=jax.ShapeDtypeStruct((n_pad, cols), compute_dtype),
        grid_spec=pltpu.PrefetchScalarGridSpec(
            num_scalar_prefetch=0,
            grid=(n_pad // tm,),
            in_specs=[pl.BlockSpec((tm, fin_pad), lambda i: (i, 0)),
                      pl.BlockSpec((fin_pad, cols), lambda i: (0, 0))],
            out_specs=pl.BlockSpec((tm, cols), lambda i: (i, 0)),
        ),
        compiler_params=pltpu.CompilerParams(
            dimension_semantics=("parallel",),
            vmem_limit_bytes=_vmem_limit(blocks, 0),
        ),
        cost_estimate=pl.CostEstimate(
            flops=2 * n_pad * fin_pad * cols,
            transcendentals=0,
            bytes_accessed=(n_pad * fin_pad * ci + fin_pad * cols * ci
                            + n_pad * cols * ci),
        ),
    )(x_p, w_p)


def _aggregate(a_p, z_p, b_p, *, tm, tk, epilogue, num_classes, out_dtype,
               z_resident):
    """out = epilogue(A_hat @ Z + b), (row-tile, k-tile) grid, f32 accumulator."""
    n_pad = a_p.shape[0]
    zc = z_p.shape[1]
    ci = jnp.dtype(a_p.dtype).itemsize
    zi = jnp.dtype(z_p.dtype).itemsize
    oi = jnp.dtype(out_dtype).itemsize

    if z_resident is None:
        # resident only if a double-buffered copy comfortably fits VMEM
        z_resident = (2 * n_pad * zc * zi) <= (24 << 20)

    if z_resident:
        z_spec = pl.BlockSpec((n_pad, zc), lambda i, k: (0, 0))
        z_block_bytes = n_pad * zc * zi
    else:
        z_spec = pl.BlockSpec((tk, zc), lambda i, k: (k, 0))
        z_block_bytes = tk * zc * zi

    blocks = [tm * tk * ci, z_block_bytes, zc * 4, tm * zc * oi]
    kern = functools.partial(aggregate_kernel, epilogue=epilogue,
                             num_classes=num_classes, z_resident=z_resident,
                             tk=tk)
    return pl.pallas_call(
        kern,
        out_shape=jax.ShapeDtypeStruct((n_pad, zc), out_dtype),
        grid_spec=pltpu.PrefetchScalarGridSpec(
            num_scalar_prefetch=0,
            grid=(n_pad // tm, n_pad // tk),
            in_specs=[pl.BlockSpec((tm, tk), lambda i, k: (i, k)),   # A_hat
                      z_spec,                                        # XW / HW
                      pl.BlockSpec((1, zc), lambda i, k: (0, 0))],   # bias
            out_specs=pl.BlockSpec((tm, zc), lambda i, k: (i, 0)),
            scratch_shapes=[pltpu.VMEM((tm, zc), jnp.float32)],
        ),
        compiler_params=pltpu.CompilerParams(
            dimension_semantics=("parallel", "arbitrary"),
            vmem_limit_bytes=_vmem_limit(blocks, tm * zc * 4),
        ),
        cost_estimate=pl.CostEstimate(
            flops=2 * n_pad * n_pad * zc,
            transcendentals=(n_pad * zc + n_pad) if epilogue == "log_softmax"
            else 0,
            bytes_accessed=(n_pad * n_pad * ci + n_pad * zc * zi + zc * 4
                            + n_pad * zc * oi),
        ),
    )(a_p, z_p, b_p)


def classification_gnn_forward(x, edge_index, params, *,
                               compute_dtype=jnp.bfloat16,
                               block_size=512, z_resident=None):
    """2-layer GCN forward: linear -> aggregate(+leaky_relu) -> linear ->
    aggregate(+log_softmax), each a Pallas call."""
    w1, b1, w2, b2 = params
    n, fin = x.shape
    hidden = w1.shape[1]
    num_classes = w2.shape[1]

    tile = _choose_tile(n, block_size)
    tm = tk = tile
    n_pad = _round_up(n, tile)
    fin_pad = _round_up(fin, LANE)
    h_pad = _round_up(hidden, LANE)
    c_pad = _round_up(num_classes, LANE)

    a_hat = build_normalized_adjacency(edge_index, n)

    # Zero-padding is semantics-preserving: padded nodes have zero A rows/cols,
    # padded feature/hidden lanes carry zero weights, padded class lanes are
    # -inf-masked inside the log_softmax and sliced off afterwards.
    a_p = _pad2d(a_hat, n_pad, n_pad, compute_dtype)
    x_p = _pad2d(x, n_pad, fin_pad, compute_dtype)
    w1_p = _pad2d(w1, fin_pad, h_pad, compute_dtype)
    b1_p = _pad2d(b1.reshape(1, -1), 1, h_pad, jnp.float32)
    w2_p = _pad2d(w2, h_pad, c_pad, compute_dtype)
    b2_p = _pad2d(b2.reshape(1, -1), 1, c_pad, jnp.float32)

    # Layer 1: reassociated as A_hat @ (X @ W1)
    xw1 = _linear(x_p, w1_p, tm=tm, compute_dtype=compute_dtype)
    h = _aggregate(a_p, xw1, b1_p, tm=tm, tk=tk, epilogue="leaky_relu",
                   num_classes=0, out_dtype=compute_dtype,
                   z_resident=z_resident)

    # Layer 2: A_hat @ (h @ W2), then log_softmax
    hw2 = _linear(h, w2_p, tm=tm, compute_dtype=compute_dtype)
    out_p = _aggregate(a_p, hw2, b2_p, tm=tm, tk=tk, epilogue="log_softmax",
                       num_classes=num_classes, out_dtype=jnp.float32,
                       z_resident=z_resident)

    return out_p[:n, :num_classes]


# ---------------------------------------------------------------------------
# Params + pure-JAX reference
# ---------------------------------------------------------------------------
def init_params(key, input_features, hidden_features, num_classes):
    """Glorot-uniform weights + small random biases (GCNConv shapes)."""
    k1, k2, k3, k4 = jax.random.split(key, 4)

    def glorot(k, fan_in, fan_out):
        lim = jnp.sqrt(6.0 / (fan_in + fan_out))
        return jax.random.uniform(k, (fan_in, fan_out), jnp.float32, -lim, lim)

    w1 = glorot(k1, input_features, hidden_features)
    b1 = 0.1 * jax.random.normal(k3, (1, hidden_features), jnp.float32)
    w2 = glorot(k2, hidden_features, num_classes)
    b2 = 0.1 * jax.random.normal(k4, (1, num_classes), jnp.float32)
    return (w1, b1, w2, b2)


def reference_forward(x, edge_index, params):
    """f32 reference matching the PyTorch module semantics."""
    a_hat = build_normalized_adjacency(edge_index, x.shape[0])
    w1, b1, w2, b2 = params
    hp = jax.lax.Precision.HIGHEST
    h = jnp.dot(a_hat, jnp.dot(x, w1, precision=hp), precision=hp) + b1
    h = jnp.where(h > 0, h, 0.2 * h)
    z = jnp.dot(a_hat, jnp.dot(h, w2, precision=hp), precision=hp) + b2
    return jax.nn.log_softmax(z, axis=1)


if __name__ == "__main__":
    key = jax.random.PRNGKey(0)
    k_x, k_p = jax.random.split(key)

    # Small shapes consistent with the module's forward (node-major features).
    num_nodes = 16
    input_features = 32
    hidden_features = 32
    num_classes = 10

    x = jax.random.normal(k_x, (num_nodes, input_features), jnp.float32)

    # Deterministic undirected ring graph: i <-> (i+1) % N
    idx = jnp.arange(num_nodes)
    src = jnp.concatenate([idx, (idx + 1) % num_nodes])
    dst = jnp.concatenate([(idx + 1) % num_nodes, idx])
    edge_index = jnp.stack([src, dst], axis=0)  # (2, E)

    params = init_params(k_p, input_features, hidden_features, num_classes)
    ref = reference_forward(x, edge_index, params)

    # Exercise both the VMEM-resident and streamed z paths.
    out_res = classification_gnn_forward(x, edge_index, params, z_resident=True)
    out_res = jax.block_until_ready(out_res)
    out_str = classification_gnn_forward(x, edge_index, params, z_resident=False)
    out_str = jax.block_until_ready(out_str)

    for out in (out_res, out_str):
        assert out.shape == (num_nodes, num_classes)
        # bf16 matmul inputs (f32 accumulation) vs the pure-f32 reference.
        assert jnp.allclose(out, ref, atol=1e-1, rtol=1e-1), "mismatch vs ref"
        # Rows must be valid log-probabilities (checks the masked log_softmax).
        row_lse = jax.scipy.special.logsumexp(out, axis=1)
        assert jnp.allclose(row_lse, 0.0, atol=1e-3), "rows not normalized"
    assert jnp.allclose(out_res, out_str, atol=1e-5), "resident != streamed"

    print("KERNEL_OK")
</pallas_src>

<mosaic_0001>
module attributes {stable_mosaic.version = 11 : i64} {
  func.func @linear_kernel(%arg0: i32, %arg1: memref<128x128xbf16, #tpu.memory_space<vmem>>, %arg2: memref<128x128xbf16, #tpu.memory_space<vmem>>, %arg3: memref<128x128xbf16, #tpu.memory_space<vmem>>) attributes {dimension_semantics = [#tpu.dimension_semantics<parallel>], iteration_bounds = array<i64: 1>, scalar_prefetch = 0 : i64, scratch_operands = 0 : i64, tpu.core_type = #tpu.core_type<tc>, window_params = [{transform_indices = @transform_0, window_bounds = array<i64: 128, 128>}, {pipeline_mode = #tpu.pipeline_mode<synchronous>, transform_indices = @transform_1, window_bounds = array<i64: 128, 128>}, {transform_indices = @transform_2, window_bounds = array<i64: 128, 128>}]} {
    %c0 = arith.constant 0 : index
    %c0_0 = arith.constant 0 : index
    %0 = vector.load %arg1[%c0, %c0_0] : memref<128x128xbf16, #tpu.memory_space<vmem>>, vector<128x128xbf16>
    %c0_1 = arith.constant 0 : index
    %c0_2 = arith.constant 0 : index
    %1 = vector.load %arg2[%c0_1, %c0_2] : memref<128x128xbf16, #tpu.memory_space<vmem>>, vector<128x128xbf16>
    %cst = arith.constant dense<0.000000e+00> : vector<128x128xf32>
    %2 = tpu.matmul %0, %1, %cst {dimension_numbers = #tpu.dot_dimension_numbers<[1], [0], [0], [1], [0, 0, 1, 1], [], []>} : vector<128x128xbf16>, vector<128x128xbf16>, vector<128x128xf32> -> vector<128x128xf32>
    %3 = arith.truncf %2 : vector<128x128xf32> to vector<128x128xbf16>
    %c0_3 = arith.constant 0 : index
    %c0_4 = arith.constant 0 : index
    %4 = vector.load %arg3[%c0_3, %c0_4] : memref<128x128xbf16, #tpu.memory_space<vmem>>, vector<128x128xbf16>
    tpu.vector_store %arg3[%c0_3, %c0_4], %3 {strides = array<i32>} : memref<128x128xbf16, #tpu.memory_space<vmem>>, vector<128x128xbf16>,
    return
  }
  func.func @transform_0(%arg0: i32) -> (i32, i32) {
    %c0_i32 = arith.constant 0 : i32
    %c0_i32_0 = arith.constant 0 : i32
    return %arg0, %c0_i32 : i32, i32
  }
  func.func @transform_1(%arg0: i32) -> (i32, i32) {
    %c0_i32 = arith.constant 0 : i32
    %c0_i32_0 = arith.constant 0 : i32
    %c0_i32_1 = arith.constant 0 : i32
    return %c0_i32, %c0_i32_0 : i32, i32
  }
  func.func @transform_2(%arg0: i32) -> (i32, i32) {
    %c0_i32 = arith.constant 0 : i32
    %c0_i32_0 = arith.constant 0 : i32
    return %arg0, %c0_i32 : i32, i32
  }
}

</mosaic_0001>

<bundles_post_ra>
// kernel: tpu_custom_call.1
= control target key start
LH: loop header
LB: loop body
LE: loop exit
PB: predicated region body
PF: predicated region fallthrough
CT: control target
= control target key end

     0   :  { %7 = vsyncpa [#allocation3], 0  ;;  %s681_s0 = inlined_call_operand.hbm [shape: bf16[128,128], index: 0, kind: input, shape index: {}]   ;;  %s682_s1 = inlined_call_operand.hbm [shape: bf16[128,128], index: 1, kind: input, shape index: {}]   ;;  %s683_s2 = inlined_call_operand.hbm [shape: bf16[128,128], index: 2, kind: output, shape index: {}]  }
   0x1   :  { %8 = vsyncpa [#allocation6], 0 }
   0x2   :  { %9 = vsyncpa [#allocation4], 0  ;;  %s616_s9 = smov [#allocation2]   ;;  %s544_s13 = scalar_lea.hbm %s681_s0, 1024 }
   0x3   :  { %s15_s10 = sshll.u32 %s616_s9, 4  ;;  %p545_p0 = scmp.ne.s32.totalorder %s681_s0, %s544_s13  ;;  %s16_s10 = int_to_ptr.vmem [resolvable:$true] %s15_s10 }
   0x4   :  { %p548_p1 = scmp.lt.u32.totalorder %s544_s13, %s681_s0 }
   0x6   :  { %p550_p2 = pnand %p548_p1, %p545_p0 }
   0x8   :  { %553 = shalt.err (!%p550_p2)
}
   0x9   :  { %s554_s18 = scalar_lea.vmem %s16_s10, 1024  ;;  %p559_p4 = scmp.lt.s32.totalorder %s16_s10, %s16_s10 }
   0xa   :  { %p555_p3 = scmp.ne.s32.totalorder %s16_s10, %s554_s18  ;;  %p560_p5 = scmp.lt.s32.totalorder %s554_s18, %s554_s18 }
   0xc   :  { %p561_p6 = por %p560_p5, %p559_p4 }
   0xe   :  { %p562_p7 = pnand %p561_p6, %p555_p3 }
  0x10   :  { %565 = shalt.err (!%p562_p7)
}
  0x11   :  { %s617_s19 = smov 64   ;;  %s618_s20 = smov 4  }
  0x12   :  { %21 = dma.hbm_to_vmem [thread:$0]  %s681_s0, 1024, %s16_s10, [#allocation3], %s617_s19, %s617_s19, %s618_s20  }
  0x13   :  { %s619_s23 = smov [#allocation5]   ;;  %s566_s27 = scalar_lea.hbm %s682_s1, 1024 }
  0x14   :  { %s27_s24 = sshll.u32 %s619_s23, 4  ;;  %p567_p8 = scmp.ne.s32.totalorder %s682_s1, %s566_s27  ;;  %s28_s24 = int_to_ptr.vmem [resolvable:$true] %s27_s24 }
  0x15   :  { %p570_p9 = scmp.lt.u32.totalorder %s566_s27, %s682_s1 }
  0x17   :  { %p572_p10 = pnand %p570_p9, %p567_p8 }
  0x19   :  { %575 = shalt.err (!%p572_p10)
}
  0x1a   :  { %s576_s4 = scalar_lea.vmem %s28_s24, 1024  ;;  %p581_p12 = scmp.lt.s32.totalorder %s28_s24, %s28_s24 }
  0x1b   :  { %p577_p11 = scmp.ne.s32.totalorder %s28_s24, %s576_s4  ;;  %p582_p13 = scmp.lt.s32.totalorder %s576_s4, %s576_s4 }
  0x1d   :  { %p583_p0 = por %p582_p13, %p581_p12 }
  0x1f   :  { %p584_p1 = pnand %p583_p0, %p577_p11 }
  0x21   :  { %587 = shalt.err (!%p584_p1)
}
  0x22   :  { %33 = dma.hbm_to_vmem [thread:$0]  %s682_s1, 1024, %s28_s24, [#allocation6], %s617_s19, %s617_s19, %s618_s20  }
  0x23   :  { %610 = dma.done.wait [#allocation3], 1024  }
  0x24   :  { %611 = vsyncadd [#allocation3], 4294966272 }
  0x25   :  { %612 = dma.done.wait [#allocation6], 1024  }
  0x26   :  { %613 = vsyncadd [#allocation6], 4294966272  ;;  %v528_v0 = vld [vmem:[#allocation5] sm:$0xff]   ;;  %v529_v1 = vld [vmem:[#allocation5 + $0x8] sm:$0xff]   ;;  %s620_s1 = smov [#allocation7]  }
  0x27   :  { %475 = vmatprep.subr.bf16.mxu0 %v528_v0  ;;  %507 = vmatprep.subr.bf16.mxu1 %v528_v0  ;;  %v530_v2 = vld [vmem:[#allocation5 + $0x10] sm:$0xff]   ;;  %v531_v3 = vld [vmem:[#allocation5 + $0x18] sm:$0xff]   ;;  %v536_v4 = vld [vmem:[#allocation2] sm:$0xff]   ;;  %s351_s6 = sshll.u32 %s620_s1, 4  ;;  %s352_s6 = int_to_ptr.vmem [resolvable:$true] %s351_s6 }
  0x28   :  { %476 = vmatpush3.bf16.msra.mxu0 %v528_v0  ;;  %515 = vmatpush3.bf16.msra.mxu1 %v528_v0  ;;  %v537_v5 = vld [vmem:[#allocation2 + $0x20] sm:$0xff]   ;;  %v533_v7 = vld [vmem:[#allocation5 + $0x28] sm:$0xff]   ;;  %v534_v8 = vld [vmem:[#allocation5 + $0x30] sm:$0xff]   ;;  %s588_s7 = scalar_lea.vmem %s352_s6, 1024  ;;  %p593_p3 = scmp.lt.s32.totalorder %s352_s6, %s352_s6 }
  0x29   :  { %477 = vmatprep.subr.bf16.mxu0 %v529_v1  ;;  %508 = vmatprep.subr.bf16.mxu1 %v529_v1  ;;  %v532_v6 = vld [vmem:[#allocation5 + $0x20] sm:$0xff]   ;;  %v535_v9 = vld [vmem:[#allocation5 + $0x38] sm:$0xff]   ;;  %v538_v10 = vld [vmem:[#allocation2 + $0x8] sm:$0xff]   ;;  %p589_p2 = scmp.ne.s32.totalorder %s352_s6, %s588_s7  ;;  %p594_p4 = scmp.lt.s32.totalorder %s588_s7, %s588_s7 }
  0x2a   :  { %491 = vmatprep.mubr.bf16.mxu0 %v536_v4  ;;  %499 = vmatprep.mubr.bf16.mxu1 %v537_v5  ;;  %v539_v11 = vld [vmem:[#allocation2 + $0x28] sm:$0xff]   ;;  %v540_v12 = vld [vmem:[#allocation2 + $0x10] sm:$0xff]   ;;  %v542_v14 = vld [vmem:[#allocation2 + $0x18] sm:$0xff]  }
  0x2b   :  { %v541_v13 = vld [vmem:[#allocation2 + $0x30] sm:$0xff]   ;;  %v543_v15 = vld [vmem:[#allocation2 + $0x38] sm:$0xff]   ;;  %p595_p5 = por %p594_p4, %p593_p3 }
  0x2c   :  { %478 = vmatpush3.bf16.msra.mxu0 %v529_v1  ;;  %516 = vmatpush3.bf16.msra.mxu1 %v529_v1 }
  0x2d   :  { %479 = vmatprep.subr.bf16.mxu0 %v530_v2  ;;  %509 = vmatprep.subr.bf16.mxu1 %v530_v2  ;;  %p596_p6 = pnand %p595_p5, %p589_p2 }
  0x30   :  { %480 = vmatpush3.bf16.msra.mxu0 %v530_v2  ;;  %517 = vmatpush3.bf16.msra.mxu1 %v530_v2 }
  0x31   :  { %481 = vmatprep.subr.bf16.mxu0 %v531_v3  ;;  %510 = vmatprep.subr.bf16.mxu1 %v531_v3 }
  0x34   :  { %482 = vmatpush3.bf16.msra.mxu0 %v531_v3  ;;  %518 = vmatpush3.bf16.msra.mxu1 %v531_v3 }
  0x35   :  { %483 = vmatprep.subr.bf16.mxu0 %v532_v6  ;;  %511 = vmatprep.subr.bf16.mxu1 %v532_v6 }
  0x38   :  { %484 = vmatpush3.bf16.msra.mxu0 %v532_v6  ;;  %519 = vmatpush3.bf16.msra.mxu1 %v532_v6 }
  0x39   :  { %485 = vmatprep.subr.bf16.mxu0 %v533_v7  ;;  %512 = vmatprep.subr.bf16.mxu1 %v533_v7 }
  0x3c   :  { %486 = vmatpush3.bf16.msra.mxu0 %v533_v7  ;;  %520 = vmatpush3.bf16.msra.mxu1 %v533_v7 }
  0x3d   :  { %487 = vmatprep.subr.bf16.mxu0 %v534_v8  ;;  %513 = vmatprep.subr.bf16.mxu1 %v534_v8 }
  0x40   :  { %488 = vmatpush3.bf16.msra.mxu0 %v534_v8  ;;  %521 = vmatpush3.bf16.msra.mxu1 %v534_v8 }
  0x41   :  { %489 = vmatprep.subr.bf16.mxu0 %v535_v9  ;;  %514 = vmatprep.subr.bf16.mxu1 %v535_v9 }
  0x44   :  { %490 = vmatpush3.bf16.msra.mxu0 %v535_v9  ;;  %522 = vmatpush3.bf16.msra.mxu1 %v535_v9 }
  0x47   :  { %492 = vmatmul.mubr.bf16.vlgmr.msra.gmra.mrb[0].mxu0 %v538_v10  ;;  %500 = vmatmul.mubr.bf16.vlgmr.msra.gmra.mrb[0].mxu1 %v539_v11 }
  0x48   :  { %495 = vmatprep.mubr.bf16.mxu0 %v540_v12  ;;  %503 = vmatprep.mubr.bf16.mxu1 %v541_v13 }
  0x4f   :  { %496 = vmatmul.mubr.bf16.gmra.mrb[4].mxu0 %v542_v14  ;;  %504 = vmatmul.mubr.bf16.gmra.mrb[4].mxu1 %v543_v15 }
 0x11a   :  { %v493_v16 = vpop.f32.mrb[0].mxu0  ;;  %v501_v17 = vpop.f32.mrb[0].mxu1 }
 0x11b   :  { %v203_v18 = vpop.f32.mrb[1].mxu0  ;;  %v235_v19 = vpop.f32.mrb[1].mxu1 }
 0x11c   :  { %v494_v20 = vpop.f32.mrb[2].mxu0  ;;  %v502_v21 = vpop.f32.mrb[2].mxu1 }
 0x11d   :  { %v420_v22 = vpack.c.bf16 %v494_v20, %v493_v16  ;;  %v440_v23 = vpack.c.bf16 %v502_v21, %v501_v17  ;;  %v206_v24 = vpop.f32.mrb[3].mxu0  ;;  %v238_v25 = vpop.f32.mrb[3].mxu1 }
 0x11e   :  { %v415_v26 = vpack.c.bf16 %v206_v24, %v203_v18  ;;  %v435_v27 = vpack.c.bf16 %v238_v25, %v235_v19 }
 0x11f   :  { %452 = vst [vmem:[#allocation7 + $0x8] sm:$0xff] %v420_v22   ;;  %456 = vst [vmem:[#allocation7 + $0x28] sm:$0xff] %v440_v23  }
 0x120   :  { %416 = vst [vmem:[#allocation7] sm:$0xff] %v415_v26   ;;  %455 = vst [vmem:[#allocation7 + $0x20] sm:$0xff] %v435_v27  }
 0x122   :  { %v497_v28 = vpop.f32.mrb[4].mxu0  ;;  %v505_v29 = vpop.f32.mrb[4].mxu1 }
 0x123   :  { %v219_v30 = vpop.f32.mrb[5].mxu0  ;;  %v251_v31 = vpop.f32.mrb[5].mxu1 }
 0x124   :  { %v498_v32 = vpop.f32.mrb[6].mxu0  ;;  %v506_v33 = vpop.f32.mrb[6].mxu1 }
 0x125   :  { %v430_v34 = vpack.c.bf16 %v498_v32, %v497_v28  ;;  %v450_v35 = vpack.c.bf16 %v506_v33, %v505_v29  ;;  %v222_v36 = vpop.f32.mrb[7].mxu0  ;;  %v254_v37 = vpop.f32.mrb[7].mxu1 }
 0x126   :  { %v425_v38 = vpack.c.bf16 %v222_v36, %v219_v30  ;;  %v445_v39 = vpack.c.bf16 %v254_v37, %v251_v31 }
 0x127   :  { %454 = vst [vmem:[#allocation7 + $0x18] sm:$0xff] %v430_v34   ;;  %458 = vst [vmem:[#allocation7 + $0x38] sm:$0xff] %v450_v35  }
 0x128   :  { %453 = vst [vmem:[#allocation7 + $0x10] sm:$0xff] %v425_v38   ;;  %457 = vst [vmem:[#allocation7 + $0x30] sm:$0xff] %v445_v39  }
 0x129   :  { %599 = shalt.err (!%p596_p6)
}
 0x12a   :  { %s600_s10 = scalar_lea.hbm %s683_s2, 1024 }
 0x12b   :  { %p601_p7 = scmp.ne.s32.totalorder %s683_s2, %s600_s10  ;;  %p604_p8 = scmp.lt.u32.totalorder %s600_s10, %s683_s2 }
 0x12d   :  { %p606_p9 = pnand %p604_p8, %p601_p7 }
 0x12f   :  { %609 = shalt.err (!%p606_p9)
}
 0x130   :  { %357 = dma.vmem_to_hbm [thread:$0]  %s352_s6, 1024, %s683_s2, [#allocation4], %s617_s19, %s617_s19, %s618_s20  }
 0x131   :  { %614 = dma.done.wait [#allocation4], 1024  }
 0x132   :  { %615 = vsyncadd [#allocation4], 4294966272 }
 0x133   :  { %361 = vsyncpa [#allocation3], 1 }
 0x134   :  { %362 = vsyncpa [#allocation6], 1 }
 0x135   :  { %363 = vsyncpa [#allocation4], 1 }

</bundles_post_ra>
